<compile_context>
chip_gen: v7x
topology: tpu7x:2x2x1
jax: 0.10.0
libtpu: 0.0.40
codegen_flags: <defaults>
</compile_context>

<pallas_src>
import math
from functools import partial

import jax
import jax.numpy as jnp
from jax.experimental import pallas as pl
from jax.experimental.pallas import tpu as pltpu


def _round_up(x, m):
    return (x + m - 1) // m * m


def _ceil_div(a, b):
    return -(-a // b)


def ffn_kernel(x_ref, w1_ref, b1_ref, w2_ref, b2_ref, w3_ref, b3_ref, o_ref, *, vpu_head):
    # Layer 1: single fused dot over the pre-concatenated [poly|salt|cont] tile.
    h1 = jnp.dot(x_ref[...], w1_ref[...], preferred_element_type=jnp.float32)
    h1 = jnp.maximum(h1 + b1_ref[...], 0.0)            # bias + ReLU in f32 (VPU)

    # Layer 2: Linear + ReLU (bf16 MXU inputs, f32 accumulate).
    h2 = jnp.dot(h1.astype(w2_ref.dtype), w2_ref[...],
                 preferred_element_type=jnp.float32)
    h2 = jnp.maximum(h2 + b2_ref[...], 0.0)

    # Output head.
    if vpu_head:
        # out_dim == 1: VPU multiply + XLU lane-reduce; no MXU pass, un-padded (TB, 1) store.
        o_ref[...] = jnp.sum(h2 * w3_ref[...], axis=-1, keepdims=True) + b3_ref[...]
    else:
        # General head: un-padded out_dim columns (block last dim == full array dim).
        o_ref[...] = (jnp.dot(h2.astype(w3_ref.dtype), w3_ref[...],
                              preferred_element_type=jnp.float32) + b3_ref[...])


def ffn_forward(poly_emb, salt_emb, continuous_vars, params, num_continuous_vars,
                *, block_batch=512):
    """JAX wrapper: slice continuous vars, fuse concat/cast/pad, run the fused FFN kernel."""
    w1, b1, w2, b2, w3, b3 = params
    cont = continuous_vars[:, :num_continuous_vars]

    B, P = poly_emb.shape
    S = salt_emb.shape[1]
    C = cont.shape[1]
    IN = P + S + C
    H = w1.shape[1]
    out_dim = w3.shape[1]
    HP = max(_round_up(H, 8), 128)          # pad small hidden dims to a full 128-lane width

    # Batch tiling: TB multiple of 8, and at least 2 grid steps so v7x's two TensorCores
    # get work and the x-DMA overlaps compute even for small/medium batches.
    B8 = _round_up(B, 8)
    n_steps = max(2, _ceil_div(B8, block_batch))
    TB = _round_up(_ceil_div(B8, n_steps), 8)
    B_pad = TB * n_steps

    compute_dtype = jnp.bfloat16            # MXU-native on v6e/v7x; halves x HBM bytes on v5e

    # Single fused concat + cast + batch-pad -> one (B_pad, IN) bf16 activation buffer.
    x = jnp.concatenate([poly_emb, salt_emb, cont], axis=1).astype(compute_dtype)
    if B_pad != B:
        x = jnp.pad(x, ((0, B_pad - B), (0, 0)))

    def pad_hidden(a, rows=False, cols=False):
        pr = (0, HP - a.shape[0]) if rows else (0, 0)
        pc = (0, HP - a.shape[1]) if cols else (0, 0)
        return jnp.pad(a, (pr, pc))

    w1c = pad_hidden(w1, cols=True).astype(compute_dtype)             # (IN, HP)
    b1c = pad_hidden(b1, cols=True).astype(jnp.float32)               # (1, HP)
    w2c = pad_hidden(w2, rows=True, cols=True).astype(compute_dtype)  # (HP, HP)
    b2c = pad_hidden(b2, cols=True).astype(jnp.float32)               # (1, HP)
    b3c = b3.astype(jnp.float32)                                      # (1, out_dim)

    vpu_head = (out_dim == 1)
    if vpu_head:
        # Head weight as a (1, HP) f32 row: VPU multiply + lane-reduce in the kernel.
        w3c = pad_hidden(w3.T, cols=True).astype(jnp.float32)         # (1, HP)
        w3_spec = pl.BlockSpec((1, HP), lambda i: (0, 0))
        head_w_bytes = HP * 4
        head_flops = 2 * B_pad * HP
    else:
        w3c = pad_hidden(w3, rows=True).astype(compute_dtype)         # (HP, out_dim)
        w3_spec = pl.BlockSpec((HP, out_dim), lambda i: (0, 0))
        head_w_bytes = HP * out_dim * 2
        head_flops = 2 * B_pad * HP * out_dim

    grid = (n_steps,)

    weight_bytes = IN * HP * 2 + HP * HP * 2 + head_w_bytes + (2 * HP + out_dim) * 4
    # VMEM budget guard (double-buffered I/O tiles + resident weights + f32 intermediates).
    # TODO(synk): for very large hidden_size (>~4096) add a K/N-tiled path for w2 instead of
    # keeping it fully VMEM-resident (v7x has only 64 MiB physical VMEM).
    vmem_needed = (2 * TB * IN * 2            # x tiles (bf16, double-buffered)
                   + 2 * TB * out_dim * 4     # out tiles (f32, double-buffered)
                   + 2 * weight_bytes         # weights/biases (conservative x2)
                   + 2 * TB * HP * 4)         # h1 / h2 f32 intermediates
    vmem_limit = int(min(128 * 1024 * 1024, max(32 * 1024 * 1024, 2 * vmem_needed)))

    cost = pl.CostEstimate(
        flops=2 * B_pad * (IN * HP + HP * HP) + head_flops,
        transcendentals=0,
        bytes_accessed=(B_pad * IN * 2            # bf16 activations in
                        + B_pad * out_dim * 4     # f32 out (un-padded)
                        + weight_bytes),
    )

    out_full = pl.pallas_call(
        partial(ffn_kernel, vpu_head=vpu_head),
        out_shape=jax.ShapeDtypeStruct((B_pad, out_dim), jnp.float32),
        grid=grid,
        in_specs=[
            pl.BlockSpec((TB, IN), lambda i: (i, 0)),     # x (batch-tiled)
            pl.BlockSpec((IN, HP), lambda i: (0, 0)),     # w1 (VMEM-resident)
            pl.BlockSpec((1, HP), lambda i: (0, 0)),      # b1
            pl.BlockSpec((HP, HP), lambda i: (0, 0)),     # w2
            pl.BlockSpec((1, HP), lambda i: (0, 0)),      # b2
            w3_spec,                                      # w3
            pl.BlockSpec((1, out_dim), lambda i: (0, 0)), # b3
        ],
        out_specs=pl.BlockSpec((TB, out_dim), lambda i: (i, 0)),
        compiler_params=pltpu.CompilerParams(
            dimension_semantics=("parallel",),
            vmem_limit_bytes=vmem_limit),
        cost_estimate=cost,
    )(x, w1c, b1c, w2c, b2c, w3c, b3c)

    return out_full[:B]


def xavier_normal(key, shape):
    # nn.init.xavier_normal_ on a (out, in) weight; built directly in (in, out) layout,
    # fan_in + fan_out is symmetric so the std is identical.
    fan_in, fan_out = shape
    std = math.sqrt(2.0 / (fan_in + fan_out))
    return std * jax.random.normal(key, shape, dtype=jnp.float32)


def init_ffn_params(key, input_dim, hidden_size, output_size):
    k1, k2, k3 = jax.random.split(key, 3)
    w1 = xavier_normal(k1, (input_dim, hidden_size))
    b1 = jnp.zeros((1, hidden_size), jnp.float32)
    w2 = xavier_normal(k2, (hidden_size, hidden_size))
    b2 = jnp.zeros((1, hidden_size), jnp.float32)
    w3 = xavier_normal(k3, (hidden_size, output_size))
    b3 = jnp.zeros((1, output_size), jnp.float32)
    return (w1, b1, w2, b2, w3, b3)


if __name__ == "__main__":
    # Small shapes consistent with the module (encoders disabled -> raw feature tensors).
    batch = 8
    num_polymer_features = 16
    num_salt_features = 8
    num_continuous_vars = 8
    hidden_size = 32
    output_size = 1
    input_dim = num_polymer_features + num_salt_features + num_continuous_vars

    key = jax.random.PRNGKey(0)
    kp, ks, kc, kw = jax.random.split(key, 4)

    poly_input = jax.random.normal(kp, (batch, num_polymer_features), dtype=jnp.float32)
    salt_input = jax.random.normal(ks, (batch, num_salt_features), dtype=jnp.float32)
    # continuous_vars arrives wider and is sliced to num_continuous_vars, as in forward().
    continuous_vars = jax.random.normal(kc, (batch, num_continuous_vars + 2), dtype=jnp.float32)

    params = init_ffn_params(kw, input_dim, hidden_size, output_size)

    # TODO(synk): TransformerEncoder branches (AutoModel.from_pretrained) require checkpoint
    # loading and are not reproducible in a self-contained kernel; encoders are disabled
    # (poly_model_name=None, salt_model_name=None), so raw feature tensors are used instead.
    out = ffn_forward(poly_input, salt_input, continuous_vars, params, num_continuous_vars)
    out = jax.block_until_ready(out)
    assert out.shape == (batch, output_size), out.shape

    # Pure-JAX reference of the same math (bf16 MXU inputs, f32 accumulation / bias / ReLU,
    # f32 head for output_size=1).
    w1, b1, w2, b2, w3, b3 = params
    bf16 = jnp.bfloat16
    x = jnp.concatenate(
        [poly_input, salt_input, continuous_vars[:, :num_continuous_vars]], axis=1)
    h1 = jnp.maximum(jnp.dot(x.astype(bf16), w1.astype(bf16),
                             preferred_element_type=jnp.float32) + b1, 0.0)
    h2 = jnp.maximum(jnp.dot(h1.astype(bf16), w2.astype(bf16),
                             preferred_element_type=jnp.float32) + b2, 0.0)
    ref = jnp.dot(h2, w3, preferred_element_type=jnp.float32) + b3
    assert jnp.allclose(out, ref, atol=2e-3, rtol=2e-3), float(jnp.max(jnp.abs(out - ref)))

    print("KERNEL_OK")
</pallas_src>

<mosaic_0001>
module attributes {stable_mosaic.version = 11 : i64} {
  func.func @ffn_kernel(%arg0: i32, %arg1: memref<8x32xbf16, #tpu.memory_space<vmem>>, %arg2: memref<32x128xbf16, #tpu.memory_space<vmem>>, %arg3: memref<1x128xf32, #tpu.memory_space<vmem>>, %arg4: memref<128x128xbf16, #tpu.memory_space<vmem>>, %arg5: memref<1x128xf32, #tpu.memory_space<vmem>>, %arg6: memref<1x128xf32, #tpu.memory_space<vmem>>, %arg7: memref<1x1xf32, #tpu.memory_space<vmem>>, %arg8: memref<8x1xf32, #tpu.memory_space<vmem>>) attributes {dimension_semantics = [#tpu.dimension_semantics<parallel>], iteration_bounds = array<i64: 2>, scalar_prefetch = 0 : i64, scratch_operands = 0 : i64, tpu.core_type = #tpu.core_type<tc>, window_params = [{transform_indices = @transform_0, window_bounds = array<i64: 8, 32>}, {pipeline_mode = #tpu.pipeline_mode<synchronous>, transform_indices = @transform_1, window_bounds = array<i64: 32, 128>}, {pipeline_mode = #tpu.pipeline_mode<synchronous>, transform_indices = @transform_2, window_bounds = array<i64: 1, 128>}, {pipeline_mode = #tpu.pipeline_mode<synchronous>, transform_indices = @transform_3, window_bounds = array<i64: 128, 128>}, {pipeline_mode = #tpu.pipeline_mode<synchronous>, transform_indices = @transform_4, window_bounds = array<i64: 1, 128>}, {pipeline_mode = #tpu.pipeline_mode<synchronous>, transform_indices = @transform_5, window_bounds = array<i64: 1, 128>}, {pipeline_mode = #tpu.pipeline_mode<synchronous>, transform_indices = @transform_6, window_bounds = array<i64: 1, 1>}, {transform_indices = @transform_7, window_bounds = array<i64: 8, 1>}]} {
    %c0 = arith.constant 0 : index
    %c0_0 = arith.constant 0 : index
    %0 = vector.load %arg1[%c0, %c0_0] : memref<8x32xbf16, #tpu.memory_space<vmem>>, vector<8x32xbf16>
    %c0_1 = arith.constant 0 : index
    %c0_2 = arith.constant 0 : index
    %1 = vector.load %arg2[%c0_1, %c0_2] : memref<32x128xbf16, #tpu.memory_space<vmem>>, vector<32x128xbf16>
    %cst = arith.constant dense<0.000000e+00> : vector<8x128xf32>
    %2 = tpu.matmul %0, %1, %cst {dimension_numbers = #tpu.dot_dimension_numbers<[1], [0], [0], [1], [0, 0, 1, 1], [], []>} : vector<8x32xbf16>, vector<32x128xbf16>, vector<8x128xf32> -> vector<8x128xf32>
    %c0_3 = arith.constant 0 : index
    %c0_4 = arith.constant 0 : index
    %3 = vector.load %arg3[%c0_3, %c0_4] : memref<1x128xf32, #tpu.memory_space<vmem>>, vector<1x128xf32>
    %4 = vector.broadcast %3 : vector<1x128xf32> to vector<8x128xf32>
    %5 = arith.addf %2, %4 : vector<8x128xf32>
    %cst_5 = arith.constant 0.000000e+00 : f32
    %6 = vector.broadcast %cst_5 : f32 to vector<8x128xf32>
    %7 = arith.maximumf %5, %6 : vector<8x128xf32>
    %8 = arith.truncf %7 : vector<8x128xf32> to vector<8x128xbf16>
    %c0_6 = arith.constant 0 : index
    %c0_7 = arith.constant 0 : index
    %9 = vector.load %arg4[%c0_6, %c0_7] : memref<128x128xbf16, #tpu.memory_space<vmem>>, vector<128x128xbf16>
    %cst_8 = arith.constant dense<0.000000e+00> : vector<8x128xf32>
    %10 = tpu.matmul %8, %9, %cst_8 {dimension_numbers = #tpu.dot_dimension_numbers<[1], [0], [0], [1], [0, 0, 1, 1], [], []>} : vector<8x128xbf16>, vector<128x128xbf16>, vector<8x128xf32> -> vector<8x128xf32>
    %c0_9 = arith.constant 0 : index
    %c0_10 = arith.constant 0 : index
    %11 = vector.load %arg5[%c0_9, %c0_10] : memref<1x128xf32, #tpu.memory_space<vmem>>, vector<1x128xf32>
    %12 = vector.broadcast %11 : vector<1x128xf32> to vector<8x128xf32>
    %13 = arith.addf %10, %12 : vector<8x128xf32>
    %cst_11 = arith.constant 0.000000e+00 : f32
    %14 = vector.broadcast %cst_11 : f32 to vector<8x128xf32>
    %15 = arith.maximumf %13, %14 : vector<8x128xf32>
    %c0_12 = arith.constant 0 : index
    %c0_13 = arith.constant 0 : index
    %16 = vector.load %arg6[%c0_12, %c0_13] : memref<1x128xf32, #tpu.memory_space<vmem>>, vector<1x128xf32>
    %17 = vector.broadcast %16 : vector<1x128xf32> to vector<8x128xf32>
    %18 = arith.mulf %15, %17 : vector<8x128xf32>
    %cst_14 = arith.constant dense<0.000000e+00> : vector<8xf32>
    %19 = vector.multi_reduction <add>, %18, %cst_14 [1] : vector<8x128xf32> to vector<8xf32>
    %20 = vector.shape_cast %19 : vector<8xf32> to vector<8x1xf32>
    %c0_15 = arith.constant 0 : index
    %c0_16 = arith.constant 0 : index
    %21 = vector.load %arg7[%c0_15, %c0_16] : memref<1x1xf32, #tpu.memory_space<vmem>>, vector<1x1xf32>
    %22 = vector.broadcast %21 : vector<1x1xf32> to vector<8x1xf32>
    %23 = arith.addf %20, %22 : vector<8x1xf32>
    %c0_17 = arith.constant 0 : index
    %c0_18 = arith.constant 0 : index
    %24 = vector.load %arg8[%c0_17, %c0_18] : memref<8x1xf32, #tpu.memory_space<vmem>>, vector<8x1xf32>
    tpu.vector_store %arg8[%c0_17, %c0_18], %23 {strides = array<i32>} : memref<8x1xf32, #tpu.memory_space<vmem>>, vector<8x1xf32>,
    return
  }
  func.func @transform_0(%arg0: i32) -> (i32, i32) {
    %c0_i32 = arith.constant 0 : i32
    %c0_i32_0 = arith.constant 0 : i32
    return %arg0, %c0_i32 : i32, i32
  }
  func.func @transform_1(%arg0: i32) -> (i32, i32) {
    %c0_i32 = arith.constant 0 : i32
    %c0_i32_0 = arith.constant 0 : i32
    %c0_i32_1 = arith.constant 0 : i32
    return %c0_i32, %c0_i32_0 : i32, i32
  }
  func.func @transform_2(%arg0: i32) -> (i32, i32) {
    %c0_i32 = arith.constant 0 : i32
    %c0_i32_0 = arith.constant 0 : i32
    %c0_i32_1 = arith.constant 0 : i32
    return %c0_i32, %c0_i32_0 : i32, i32
  }
  func.func @transform_3(%arg0: i32) -> (i32, i32) {
    %c0_i32 = arith.constant 0 : i32
    %c0_i32_0 = arith.constant 0 : i32
    %c0_i32_1 = arith.constant 0 : i32
    return %c0_i32, %c0_i32_0 : i32, i32
  }
  func.func @transform_4(%arg0: i32) -> (i32, i32) {
    %c0_i32 = arith.constant 0 : i32
    %c0_i32_0 = arith.constant 0 : i32
    %c0_i32_1 = arith.constant 0 : i32
    return %c0_i32, %c0_i32_0 : i32, i32
  }
  func.func @transform_5(%arg0: i32) -> (i32, i32) {
    %c0_i32 = arith.constant 0 : i32
    %c0_i32_0 = arith.constant 0 : i32
    %c0_i32_1 = arith.constant 0 : i32
    return %c0_i32, %c0_i32_0 : i32, i32
  }
  func.func @transform_6(%arg0: i32) -> (i32, i32) {
    %c0_i32 = arith.constant 0 : i32
    %c0_i32_0 = arith.constant 0 : i32
    %c0_i32_1 = arith.constant 0 : i32
    return %c0_i32, %c0_i32_0 : i32, i32
  }
  func.func @transform_7(%arg0: i32) -> (i32, i32) {
    %c0_i32 = arith.constant 0 : i32
    %c0_i32_0 = arith.constant 0 : i32
    return %arg0, %c0_i32 : i32, i32
  }
}

</mosaic_0001>

<bundles_post_ra>
// kernel: tpu_custom_call.1
= control target key start
LH: loop header
LB: loop body
LE: loop exit
PB: predicated region body
PF: predicated region fallthrough
CT: control target
= control target key end

     0   :  { %s1112_s0 = inlined_call_operand.hbm [shape: bf16[16,32], index: 0, kind: input, shape index: {}]   ;;  %s1113_s1 = inlined_call_operand.hbm [shape: bf16[32,128], index: 1, kind: input, shape index: {}]   ;;  %s1114_s2 = inlined_call_operand.vmem [shape: f32[1,128], index: 2, kind: input, shape index: {}]   ;;  %s1115_s3 = inlined_call_operand.hbm [shape: bf16[128,128], index: 3, kind: input, shape index: {}]   ;;  %s1116_s4 = inlined_call_operand.vmem [shape: f32[1,128], index: 4, kind: input, shape index: {}]   ;;  %s1117_s5 = inlined_call_operand.vmem [shape: f32[1,128], index: 5, kind: input, shape index: {}]   ;;  %s1118_s6 = inlined_call_operand.<no memory space> [shape: f32[1,1], index: 6, kind: input, shape index: {}]   ;;  %s1119_s7 = inlined_call_operand.vmem [shape: f32[16,1], index: 7, kind: output, shape index: {}]  }
   0x1   :  { %v12_v0 = vstv %s1118_s6 }
   0x2   :  { %13 = vst [vmem:[#allocation2] sm:$0x1] %v12_v0 }
   0x3   :  { %14 = vsyncpa [#allocation4], 0 }
   0x4   :  { %16 = vsyncpa [#allocation4 + $0x1], 0 }
   0x5   :  { %17 = vsyncpa [#allocation6], 0  ;;  %s931_s26 = smov 0   ;;  %s933_s27 = smov 0  }
   0x6   :  { %s935_s28 = smov 0   ;;  %s937_s29 = smov 0  }
   0x7 LB: > { %s950_s6 = sadd.s32 4294967295, %s879_s29   ;;  %p43_p0 = scmp.ne.s32.totalorder %s871_s27, %s867_s26  ;;  %s879_s29 = sphi %s937_s29, %s1134_s29   ;;  %s875_s28 = sphi %s935_s28, %s1133_s28   ;;  %s871_s27 = sphi %s933_s27, %s1132_s27   ;;  %s867_s26 = sphi %s931_s26, %s1131_s26  }
   0x8   : > { %p1120_p1 = scmp.eq.s32.totalorder %s950_s6, 0  ;;  %p613_p2 = scmp.ge.s32.totalorder %s879_s29, 1 }
   0x9   : > { %p206_p3 = scmp.lt.s32.totalorder %s879_s29, 3  ;;  %s881_s9 = smov [#allocation5]  }
   0xa   : > { %p958_p4 = por %p1120_p1, %p43_p0  ;;  %s218_s10 = sshll.u32 %s881_s9, 4  ;;  %s219_s10 = int_to_ptr.vmem [resolvable:$true] %s218_s10 }
   0xb   : > { %p962_p5 = pnand %p613_p2, %p206_p3  ;;  %s882_s12 = smov [#allocation7]  }
   0xc   : > { %s1123_s30 = scalar_select %p958_p4, 1, 0 }
   0xd   : > { %s1124_s8 = scalar_select %p962_p5, 1, 0 }
   0xe   : > { %p691_p6 = pneg %p962_p5  ;;  %s234_s13 = sshll.u32 %s882_s12, 4  ;;  %s974_s13 = int_to_ptr.vmem [resolvable:$true] %s234_s13 }
   0xf   : > { %s755_s16 = scalar_lea.hbm %s1113_s1, 256 }
  0x10   : > { %p970_p7 = pnand %p691_p6, %p1120_p1  ;;  %p756_p8 = scmp.ne.s32.totalorder %s1113_s1, %s755_s16 }
  0x11   : > { %p762_p12 = scmp.lt.u32.totalorder %s755_s16, %s1113_s1 }
  0x12   : > { %p757_p9 = pneg %p970_p7 }
  0x14   : > { %p758_p10 = pnand %p757_p9, %p756_p8 }
  0x16   : > { %p759_p11 = pneg %p758_p10 }
  0x18   : > { %p764_p13 = pnand %p762_p12, %p759_p11 }
  0x1a   : > { %767 = shalt.err (!%p764_p13)
}
  0x1b   : > { %s768_s21 = scalar_lea.vmem %s219_s10, 256  ;;  %p776_p6 = scmp.lt.s32.totalorder %s219_s10, %s219_s10 }
  0x1c   : > { %p769_p0 = scmp.ne.s32.totalorder %s219_s10, %s768_s21  ;;  %p777_p1 = scmp.lt.s32.totalorder %s768_s21, %s768_s21 }
  0x1e   : > { %p771_p2 = pnand %p769_p0, %p757_p9  ;;  %p778_p4 = por %p777_p1, %p776_p6 }
  0x20   : > { %p772_p3 = pneg %p771_p2 }
  0x22   : > { %p779_p5 = pnand %p778_p4, %p772_p3 }
  0x24   : > { %782 = shalt.err (!%p779_p5)
}
  0x25   : > { %s883_s22 = smov 64   ;;  %s884_s23 = smov 4  }
  0x26   : > { %694 = dma.hbm_to_vmem [thread:$0]  (!%p970_p7), %s1113_s1, 256, %s219_s10, [#allocation6], %s883_s22, %s883_s22, %s884_s23  }
  0x27   : > { %s783_s12 = scalar_lea.hbm %s1115_s3, 1024 }
  0x28   : > { %p784_p8 = scmp.ne.s32.totalorder %s1115_s3, %s783_s12  ;;  %p790_p5 = scmp.lt.u32.totalorder %s783_s12, %s1115_s3 }
  0x2a   : > { %p786_p1 = pnand %p784_p8, %p757_p9 }
  0x2c   : > { %p787_p4 = pneg %p786_p1 }
  0x2e   : > { %p792_p10 = pnand %p790_p5, %p787_p4 }
  0x30   : > { %795 = shalt.err (!%p792_p10)
}
  0x31   : > { %s796_s10 = scalar_lea.vmem %s974_s13, 1024  ;;  %p804_p0 = scmp.lt.s32.totalorder %s974_s13, %s974_s13 }
  0x32   : > { %p797_p11 = scmp.ne.s32.totalorder %s974_s13, %s796_s10  ;;  %p805_p2 = scmp.lt.s32.totalorder %s796_s10, %s796_s10 }
  0x34   : > { %p799_p12 = pnand %p797_p11, %p757_p9  ;;  %p806_p3 = por %p805_p2, %p804_p0 }
  0x36   : > { %p800_p13 = pneg %p799_p12 }
  0x38   : > { %p807_p6 = pnand %p806_p3, %p800_p13 }
  0x3a   : > { %810 = shalt.err (!%p807_p6)
}
  0x3b   : > { %697 = dma.hbm_to_vmem [thread:$0]  (!%p970_p7), %s1115_s3, 1024, %s974_s13, [#allocation6], %s883_s22, %s883_s22, %s884_s23  }
  0x3c   : > { %s1024_s20 = sadd.s32 1, %s879_s29   ;;  %s30_s21 = sadd.s32 1, %s875_s28 }
  0x3d   : > { %s27_s11 = ssub.s32 %s879_s29, %s1024_s20  ;;  %p37_p9 = scmp.ne.s32.totalorder %s875_s28, %s871_s27 }
  0x3e   : > { %p28_p8 = scmp.eq.s32.totalorder %s27_s11, 0  ;;  %p38_p1 = scmp.eq.s32.totalorder %s879_s29, 0 }
  0x3f   : > { %p704_p4 = scmp.lt.s32.totalorder %s879_s29, 2  ;;  %s257_s24 = sand.u32 1, %s875_s28  }
  0x40   : > { %s1035_s25 = scalar_select %p28_p8, %s875_s28, %s30_s21  }
  0x41   : > { %p39_p5 = por %p38_p1, %p37_p9  ;;  %s617_s26 = sshll.u32 %s257_s24, 2 }
  0x42   : > { %s618_s9 = sshll.u32 %s879_s29, 6  ;;  %s261_s13 = scalar_lea.vmem [#allocation3], %s617_s26 }
  0x43   : > { %s1041_s15 = scalar_lea.hbm %s1112_s0, %s618_s9  ;;  %s268_s22 = sshll.u32 %s261_s13, 4  ;;  %s1047_s22 = int_to_ptr.vmem [resolvable:$true] %s268_s22 }
  0x44   : > { %p1043_p7 = pnand %p704_p4, %p39_p5  ;;  %s258_s29 = scalar_lea.sflag [#allocation4], %s257_s24 }
  0x45   : > { %s811_s16 = scalar_lea.hbm %s1041_s15, 64  ;;  %s816_s18 = scalar_lea.hbm %s1112_s0, 128 }
  0x46   : > { %p812_p10 = scmp.ne.s32.totalorder %s1041_s15, %s811_s16  ;;  %p813_p11 = pneg %p1043_p7 }
  0x47   : > { %p817_p0 = scmp.lt.u32.totalorder %s1041_s15, %s1112_s0  ;;  %p818_p2 = scmp.lt.u32.totalorder %s816_s18, %s811_s16 }
  0x48   : > { %p814_p12 = pnand %p813_p11, %p812_p10  ;;  %p820_p6 = scmp.lt.u32.totalorder %s811_s16, %s1041_s15 }
  0x49   : > { %p819_p3 = por %p818_p2, %p817_p0 }
  0x4a   : > { %p815_p13 = pneg %p814_p12 }
  0x4b   : > { %p821_p9 = por %p820_p6, %p819_p3 }
  0x4d   : > { %p822_p8 = pnand %p821_p9, %p815_p13 }
  0x4f   : > { %825 = shalt.err (!%p822_p8)
}
  0x50   : > { %s826_s11 = scalar_lea.vmem %s1047_s22, 64  ;;  %s885_s24 = smov [#allocation3]  }
  0x51   : > { %p827_p1 = scmp.ne.s32.totalorder %s1047_s22, %s826_s11  ;;  %s831_s26 = sshll.u32 %s885_s24, 4  ;;  %s832_s26 = int_to_ptr.vmem [resolvable:$false] %s831_s26 }
  0x52   : > { %s833_s9 = scalar_lea.vmem %s832_s26, 128  ;;  %p834_p10 = scmp.lt.s32.totalorder %s1047_s22, %s832_s26 }
  0x53   : > { %p829_p4 = pnand %p827_p1, %p813_p11  ;;  %p835_p12 = scmp.lt.s32.totalorder %s833_s9, %s826_s11 }
  0x55   : > { %p830_p5 = pneg %p829_p4  ;;  %p836_p0 = por %p835_p12, %p834_p10 }
  0x57   : > { %p837_p2 = pnand %p836_p0, %p830_p5 }
  0x59   : > { %840 = shalt.err (!%p837_p2)
}
  0x5a   : > { %701 = dma.hbm_to_vmem [thread:$0]  (!%p1043_p7), %s1041_s15, 64, %s1047_s22, %s258_s29  }
  0x5b   : > { %p1127_p13 = scmp.ne.s32.totalorder %s1124_s8, 0 }
  0x5c   : > { %s279_s12 = sand.u32 (!%p1127_p13), 1, %s871_s27   ;;  %p1128_p11 = scmp.ne.s32.totalorder (!%p1127_p13), %s1123_s30, 0 }
  0x5d   : > { %277 = sbr.rel (%p1127_p13) target bundleno = 695 (0x2b7), region = 48  ;;  %s620_s14 = sshll.u32 (!%p1127_p13), %s279_s12, 2 }
  0x5e   : > { %s280_s13 = scalar_lea.sflag (!%p1127_p13), [#allocation4], %s279_s12  ;;  %s283_s16 = scalar_lea.vmem (!%p1127_p13), [#allocation3], %s620_s14 }
  0x64   : > { %858 = dma.done.wait (%p1128_p11), %s280_s13, 64  }
  0x65   : > { %860 = vsyncadd (%p1128_p11), %s280_s13, 4294967232  ;;  %p1129_p3 = scmp.eq.s32.totalorder %s950_s6, 0 }
  0x67   : > { %862 = dma.done.wait (%p1129_p3), [#allocation6], 1280   ;;  %p1130_p6 = pmov %p1129_p3 }
  0x68   : > { %v886_v1 = vmov 0.0   ;;  %vm887_vm0 = vmmov 0   ;;  %v745_v2 = vld [vmem:[#allocation5] sm:$0xff]   ;;  %v746_v3 = vld [vmem:[#allocation5 + $0x8] sm:$0xff]   ;;  %v747_v4 = vld [vmem:[#allocation7] sm:$0xff]   ;;  %vm350_vm1 = vcmask 261120  }
  0x69   : > { %864 = vsyncadd (%p1130_p6), [#allocation6], 4294966016  ;;  %653 = vmatprep.subr.bf16.mxu0 %v886_v1  ;;  %657 = vmatprep.mubr.msk.bf16.mxu0 %vm887_vm0, %v886_v1  ;;  %v748_v5 = vld [vmem:[#allocation7 + $0x8] sm:$0xff]   ;;  %v749_v7 = vld [vmem:[#allocation7 + $0x10] sm:$0xff]   ;;  %p321_p7 = scmp.lt.s32.totalorder %s950_s6, 1  ;;  %vm526_vm2 = vcmask 7168  }
  0x6a   : > { %661 = vmatprep.subr.bf16.mxu1 %v886_v1  ;;  %677 = vmatprep.mubr.msk.bf16.mxu1 %vm887_vm0, %v886_v1  ;;  %v326_v6 = vld [vmem:[%s283_s16] sm:$0xf]  ;;  %v750_v8 = vld [vmem:[#allocation7 + $0x18] sm:$0xff]   ;;  %v751_v9 = vld [vmem:[#allocation7 + $0x20] sm:$0xff]  }
  0x6b   : > { %654 = vmatpush3.bf16.msra.mxu0 %v745_v2  ;;  %662 = vmatpush3.bf16.msra.mxu1 %v747_v4  ;;  %v752_v10 = vld [vmem:[#allocation7 + $0x28] sm:$0xff]   ;;  %v753_v11 = vld [vmem:[#allocation7 + $0x30] sm:$0xff]   ;;  %v754_v12 = vld [vmem:[#allocation7 + $0x38] sm:$0xff]   ;;  %s1136_s6 = smov (!%p321_p7, %s950_s6), 1 }
  0x6c   : > { %655 = vmatprep.subr.bf16.mxu0 %v886_v1  ;;  %663 = vmatprep.subr.bf16.mxu1 %v886_v1  ;;  %v624_v13 = vld [vmem:[%s1114_s2] ss:$0 sm:$0xff]  ;;  %s623_s17 = sshll.u32 %s1136_s6, 3 }
  0x6d   : > { %v628_v21 = vld [vmem:[%s1116_s4] ss:$0 sm:$0xff]  ;;  %s324_s19 = scalar_lea.vmem %s1119_s7, %s623_s17 }
  0x6e   : > { %v637_v26 = vld [vmem:[%s1117_s5] ss:$0 sm:$0xff] }
  0x6f   : > { %656 = vmatpush3.bf16.msra.mxu0 %v746_v3  ;;  %664 = vmatpush3.bf16.msra.mxu1 %v748_v5  ;;  %v638_v30 = vld [vmem:[#allocation2] ss:$0 sm:$0xff] }
  0x70   : > { %665 = vmatprep.subr.bf16.mxu1 %v886_v1 }
  0x72   : > { %658 = vmatmul.mubr.msk.bf16.vlgmr.msra.gmra.mrb[0].mxu0 %vm350_vm1, %v326_v6 }
  0x73   : > { %666 = vmatpush3.bf16.msra.mxu1 %v749_v7 }
  0x74   : > { %667 = vmatprep.subr.bf16.mxu1 %v886_v1 }
  0x77   : > { %668 = vmatpush3.bf16.msra.mxu1 %v750_v8 }
  0x78   : > { %669 = vmatprep.subr.bf16.mxu1 %v886_v1 }
  0x7b   : > { %670 = vmatpush3.bf16.msra.mxu1 %v751_v9 }
  0x7c   : > { %671 = vmatprep.subr.bf16.mxu1 %v886_v1 }
  0x7f   : > { %672 = vmatpush3.bf16.msra.mxu1 %v752_v10 }
  0x80   : > { %673 = vmatprep.subr.bf16.mxu1 %v886_v1 }
  0x83   : > { %674 = vmatpush3.bf16.msra.mxu1 %v753_v11 }
  0x84   : > { %675 = vmatprep.subr.bf16.mxu1 %v886_v1 }
  0x87   : > { %676 = vmatpush3.bf16.msra.mxu1 %v754_v12 }
 0x145   : > { %v388_v14 = vpop.f32.mrb[0].mxu0 }
 0x146   : > { %v389_v15 = vadd.f32 %v624_v13, %v388_v14  ;;  %v659_v16 = vpop.f32.mrb[1].mxu0 }
 0x147   : > { %v391_v17 = vpop.f32.mrb[2].mxu0 }
 0x148   : > { %v394_v18 = vmax.f32 %v389_v15, 0.0  ;;  %v660_v19 = vpop.f32.mrb[3].mxu0 }
 0x14a   : > { %v395_v20 = vpack.c.bf16 %v394_v18, %v394_v18 }
 0x14c   : > { %678 = vmatmul.mubr.bf16.vlgmr.msra.gmra.mrb[0].mxu1 %v395_v20 }
 0x21f   : > { %v501_v22 = vpop.f32.mrb[0].mxu1 }
 0x220   : > { %v502_v23 = vadd.f32 %v628_v21, %v501_v22  ;;  %v679_v24 = vpop.f32.mrb[1].mxu1 }
 0x221   : > { %v504_v25 = vpop.f32.mrb[2].mxu1 }
 0x222   : > { %v507_v27 = vmax.f32 %v502_v23, 0.0  ;;  %v680_v28 = vpop.f32.mrb[3].mxu1 }
 0x224   : > { %v515_v29 = vmul.f32 %v637_v26, %v507_v27 }
 0x226   : > { %516 = vadd.xlane.f32.xlu0 %v515_v29 }
 0x2b3   : > { %v517_v31 = vpop.xlane.xlu0 %516 }
 0x2b4   : > { %v525_v32 = vadd.f32 %v638_v30, %v517_v31 }
 0x2b6   : > { %527 = vst.msk [vmem:[%s324_s19] sm:$0xff] %vm526_vm2, %v525_v32 }
 0x2b7 PF: > { %p20_p9 = scmp.ge.s32.totalorder %s1024_s20, 4   ;;  %s1131_s26 = smov %s871_s27 }
 0x2b8   : > { %s1132_s27 = smov %s875_s28  ;;  %s1133_s28 = smov %s1035_s25 }
 0x2b9   : > { %s1134_s29 = smov %s1024_s20  ;;  %22 = sbr.rel (!%p20_p9) target bundleno = 7 (0x7), region = 96 }
 0x2c0   :  { %547 = vsyncpa [#allocation4], 1 }
 0x2c1   :  { %549 = vsyncpa [#allocation4 + $0x1], 1 }
 0x2c2   :  { %550 = vsyncpa [#allocation6], 1 }

</bundles_post_ra>
